<compile_context>
chip_gen: v7x
topology: tpu7x:2x2x1
jax: 0.10.0
libtpu: 0.0.40
codegen_flags: <defaults>
</compile_context>

<pallas_src>
import jax
import jax.numpy as jnp
import numpy as np
from jax.experimental import pallas as pl
from jax.experimental.pallas import tpu as pltpu

KSZ = 5   # conv kernel size (both layers)
STR = 3   # conv stride
PAD = 2   # conv spatial padding
C1 = 3    # conv1 output channels
C2 = 6    # conv2 output channels
KK = KSZ * KSZ


def _round_up(x, m):
    return (x + m - 1) // m * m


def _conv_out_size(n):
    return (n + 2 * PAD - KSZ) // STR + 1


def _extract_windows(a, oh, ow):
    """a: (N, Hp, Wp, C), spatially pre-padded -> (N, oh, ow, KSZ*KSZ, C).

    Window-offset order is row-major (p*KSZ + q). Pure strided slices + one stack,
    no transposes (everything stays channel-last).
    """
    slabs = []
    for p in range(KSZ):
        for q in range(KSZ):
            slabs.append(a[:, p:p + STR * oh:STR, q:q + STR * ow:STR, :])
    return jnp.stack(slabs, axis=3)


def _layer2_valid_mask(n, oh1, ow1, oh2, ow2):
    """(n*oh2*ow2, KK*C1) {0,1} mask: zero where a layer-2 patch offset falls inside
    layer-2's spatial zero-padding (there tanh(b1) must be suppressed to 0)."""
    valid = np.zeros((oh2, ow2, KSZ, KSZ), np.float32)
    for u in range(oh2):
        for v in range(ow2):
            for p in range(KSZ):
                for q in range(KSZ):
                    i = STR * u + p - PAD
                    j = STR * v + q - PAD
                    if 0 <= i < oh1 and 0 <= j < ow1:
                        valid[u, v, p, q] = 1.0
    m = np.repeat(valid.reshape(oh2 * ow2, KK), C1, axis=1)   # (oh2*ow2, KK*C1)
    return np.tile(m, (n, 1))                                 # (n*oh2*ow2, KK*C1)


def _encoder_kernel(p_ref, w1_ref, b1_ref, m_ref, w2_ref, b2_ref, o_ref):
    # Layer 1: im2col matmul (bf16 operands, f32 accumulate) + bias + tanh, then
    # zero out the positions that fall inside layer-2's spatial padding.
    z1 = jnp.dot(p_ref[...], w1_ref[...], preferred_element_type=jnp.float32)
    h = jnp.tanh(z1 + b1_ref[...]) * m_ref[...]
    # Layer 2: matmul over (kh, kw, c1) + bias + tanh; lane-slim (C2=6) output.
    z2 = jnp.dot(h, w2_ref[...], preferred_element_type=jnp.float32)
    o_ref[...] = jnp.tanh(z2 + b2_ref[...])


@jax.jit
def encoder_forward(params, x):
    """x: (N, 1, H, W) NCHW float32 -> (N, 6, OH2, OW2) NCHW float32."""
    w1, b1, w2, b2 = params
    n, cin, h_in, w_in = x.shape
    assert cin == 1 and w1.shape == (C1, 1, KSZ, KSZ) and w2.shape == (C2, C1, KSZ, KSZ)
    oh1, ow1 = _conv_out_size(h_in), _conv_out_size(w_in)
    oh2, ow2 = _conv_out_size(oh1), _conv_out_size(ow1)
    m_rows = n * oh2 * ow2

    # --- host glue: nested im2col, channel-last throughout, no transposes --------
    x_sp = jnp.pad(x[:, 0, :, :], ((0, 0), (PAD, PAD), (PAD, PAD)))
    p1 = _extract_windows(x_sp[..., None], oh1, ow1)              # (N, OH1, OW1, 25, 1)
    p1 = p1.reshape(n, oh1, ow1, KK)                              # layer-1 patches
    p1_sp = jnp.pad(p1, ((0, 0), (PAD, PAD), (PAD, PAD), (0, 0)))
    p2 = _extract_windows(p1_sp, oh2, ow2)                        # (N, OH2, OW2, 25, 25)
    pmat = p2.reshape(m_rows, KK * KK)                            # (M, 625); col = pq*25 + ab

    # --- weights: layer-1 block-diagonal, layer-2 flat, matching K orders --------
    w1_mat = w1.reshape(C1, KK).T                                 # (25, 3)   [ab, c1]
    w1_blk = jnp.kron(jnp.eye(KK, dtype=w1.dtype), w1_mat)        # (625, 75) [pq*25+ab, pq*3+c1]
    b1_wide = jnp.tile(b1, KK)                                    # (75,)     [pq*3+c1]
    w2_mat = jnp.transpose(w2, (2, 3, 1, 0)).reshape(KK * C1, C2)  # (75, 6), same K order
    mask = jnp.asarray(_layer2_valid_mask(n, oh1, ow1, oh2, ow2))  # (M, 75)

    # --- lane-dim padding only (one jnp.pad per operand, Mosaic-friendly tiles) --
    k1p = _round_up(KK * KK, 128)        # 640
    khp = _round_up(KK * C1, 128)        # 128 (hidden width)
    mp = _round_up(m_rows, 16)           # bf16 sublane tile; no-op at this geometry

    p_p = jnp.pad(pmat, ((0, mp - m_rows), (0, k1p - KK * KK))).astype(jnp.bfloat16)
    w1_p = jnp.pad(w1_blk, ((0, k1p - KK * KK), (0, khp - KK * C1))).astype(jnp.bfloat16)
    b1_p = jnp.pad(b1_wide, (0, khp - KK * C1)).reshape(1, khp)
    m_p = jnp.pad(mask, ((0, mp - m_rows), (0, khp - KK * C1)))
    w2_p = jnp.pad(w2_mat, ((0, khp - KK * C1), (0, 0)))
    b2_p = b2.reshape(1, C2)

    tm = mp if mp <= 256 else 256
    grid = (pl.cdiv(mp, tm),)

    out_mat = pl.pallas_call(
        _encoder_kernel,
        out_shape=jax.ShapeDtypeStruct((mp, C2), jnp.float32),
        grid=grid,
        in_specs=[
            pl.BlockSpec((tm, k1p), lambda i: (i, 0)),    # P, blocked over M
            pl.BlockSpec((k1p, khp), lambda i: (0, 0)),   # W1 (block-diagonal)
            pl.BlockSpec((1, khp), lambda i: (0, 0)),     # b1 (widened)
            pl.BlockSpec((tm, khp), lambda i: (i, 0)),    # layer-2 padding mask
            pl.BlockSpec((khp, C2), lambda i: (0, 0)),    # W2
            pl.BlockSpec((1, C2), lambda i: (0, 0)),      # b2
        ],
        out_specs=pl.BlockSpec((tm, C2), lambda i: (i, 0)),
        compiler_params=pltpu.CompilerParams(
            dimension_semantics=("parallel",)),
    )(p_p, w1_p, b1_p, m_p, w2_p, b2_p)

    out = out_mat[:m_rows].reshape(n, oh2, ow2, C2)
    return jnp.transpose(out, (0, 3, 1, 2))               # single NHWC->NCHW at the end


def init_encoder_params(key):
    """Deterministic init matching PyTorch Conv2d defaults: U(-s, s), s=1/sqrt(fan_in)."""
    k1, k2, k3, k4 = jax.random.split(key, 4)
    s1 = 1.0 / (1 * KSZ * KSZ) ** 0.5
    w1 = jax.random.uniform(k1, (C1, 1, KSZ, KSZ), jnp.float32, -s1, s1)
    b1 = jax.random.uniform(k2, (C1,), jnp.float32, -s1, s1)
    s2 = 1.0 / (C1 * KSZ * KSZ) ** 0.5
    w2 = jax.random.uniform(k3, (C2, C1, KSZ, KSZ), jnp.float32, -s2, s2)
    b2 = jax.random.uniform(k4, (C2,), jnp.float32, -s2, s2)
    return (w1, b1, w2, b2)


def _reference_encoder(params, x):
    """Plain-XLA f32 reference (HIGHEST precision) for the self-check."""
    w1, b1, w2, b2 = params
    dn = ("NCHW", "OIHW", "NCHW")
    y = jax.lax.conv_general_dilated(x, w1, (STR, STR), ((PAD, PAD), (PAD, PAD)),
                                     dimension_numbers=dn,
                                     precision=jax.lax.Precision.HIGHEST)
    y = jnp.tanh(y + b1[None, :, None, None])
    z = jax.lax.conv_general_dilated(y, w2, (STR, STR), ((PAD, PAD), (PAD, PAD)),
                                     dimension_numbers=dn,
                                     precision=jax.lax.Precision.HIGHEST)
    return jnp.tanh(z + b2[None, :, None, None])


if __name__ == "__main__":
    key = jax.random.PRNGKey(0)
    pkey, xkey = jax.random.split(key)
    params = init_encoder_params(pkey)
    # Single-channel NCHW input (MNIST-style): (2, 1, 36, 36) -> (2, 6, 4, 4).
    x = jax.random.normal(xkey, (2, 1, 36, 36), jnp.float32)
    out = jax.block_until_ready(encoder_forward(params, x))
    assert out.shape == (2, 6, 4, 4), out.shape
    assert bool(jnp.all(jnp.isfinite(out)))
    ref = _reference_encoder(params, x)
    max_err = float(jnp.max(jnp.abs(out - ref)))
    assert max_err < 5e-2, f"kernel/reference mismatch: {max_err}"
    print("KERNEL_OK")
</pallas_src>

<mosaic_0001>
module attributes {stable_mosaic.version = 11 : i64} {
  func.func @_encoder_kernel(%arg0: i32, %arg1: memref<32x640xbf16, #tpu.memory_space<vmem>>, %arg2: memref<640x128xbf16, #tpu.memory_space<vmem>>, %arg3: memref<1x128xf32, #tpu.memory_space<vmem>>, %arg4: memref<32x128xf32, #tpu.memory_space<vmem>>, %arg5: memref<128x6xf32, #tpu.memory_space<vmem>>, %arg6: memref<1x6xf32, #tpu.memory_space<vmem>>, %arg7: memref<32x6xf32, #tpu.memory_space<vmem>>) attributes {dimension_semantics = [#tpu.dimension_semantics<parallel>], iteration_bounds = array<i64: 1>, scalar_prefetch = 0 : i64, scratch_operands = 0 : i64, tpu.core_type = #tpu.core_type<tc>, window_params = [{transform_indices = @transform_0, window_bounds = array<i64: 32, 640>}, {pipeline_mode = #tpu.pipeline_mode<synchronous>, transform_indices = @transform_1, window_bounds = array<i64: 640, 128>}, {pipeline_mode = #tpu.pipeline_mode<synchronous>, transform_indices = @transform_2, window_bounds = array<i64: 1, 128>}, {transform_indices = @transform_3, window_bounds = array<i64: 32, 128>}, {pipeline_mode = #tpu.pipeline_mode<synchronous>, transform_indices = @transform_4, window_bounds = array<i64: 128, 6>}, {pipeline_mode = #tpu.pipeline_mode<synchronous>, transform_indices = @transform_5, window_bounds = array<i64: 1, 6>}, {transform_indices = @transform_6, window_bounds = array<i64: 32, 6>}]} {
    %c0 = arith.constant 0 : index
    %c0_0 = arith.constant 0 : index
    %0 = vector.load %arg1[%c0, %c0_0] : memref<32x640xbf16, #tpu.memory_space<vmem>>, vector<32x640xbf16>
    %c0_1 = arith.constant 0 : index
    %c0_2 = arith.constant 0 : index
    %1 = vector.load %arg2[%c0_1, %c0_2] : memref<640x128xbf16, #tpu.memory_space<vmem>>, vector<640x128xbf16>
    %cst = arith.constant dense<0.000000e+00> : vector<32x128xf32>
    %2 = tpu.matmul %0, %1, %cst {dimension_numbers = #tpu.dot_dimension_numbers<[1], [0], [0], [1], [0, 0, 1, 1], [], []>} : vector<32x640xbf16>, vector<640x128xbf16>, vector<32x128xf32> -> vector<32x128xf32>
    %c0_3 = arith.constant 0 : index
    %c0_4 = arith.constant 0 : index
    %3 = vector.load %arg3[%c0_3, %c0_4] : memref<1x128xf32, #tpu.memory_space<vmem>>, vector<1x128xf32>
    %4 = vector.broadcast %3 : vector<1x128xf32> to vector<32x128xf32>
    %5 = arith.addf %2, %4 : vector<32x128xf32>
    %6 = math.tanh %5 : vector<32x128xf32>
    %c0_5 = arith.constant 0 : index
    %c0_6 = arith.constant 0 : index
    %7 = vector.load %arg4[%c0_5, %c0_6] : memref<32x128xf32, #tpu.memory_space<vmem>>, vector<32x128xf32>
    %8 = arith.mulf %6, %7 : vector<32x128xf32>
    %c0_7 = arith.constant 0 : index
    %c0_8 = arith.constant 0 : index
    %9 = vector.load %arg5[%c0_7, %c0_8] : memref<128x6xf32, #tpu.memory_space<vmem>>, vector<128x6xf32>
    %cst_9 = arith.constant dense<0.000000e+00> : vector<32x6xf32>
    %10 = tpu.matmul %8, %9, %cst_9 {dimension_numbers = #tpu.dot_dimension_numbers<[1], [0], [0], [1], [0, 0, 1, 1], [], []>} : vector<32x128xf32>, vector<128x6xf32>, vector<32x6xf32> -> vector<32x6xf32>
    %c0_10 = arith.constant 0 : index
    %c0_11 = arith.constant 0 : index
    %11 = vector.load %arg6[%c0_10, %c0_11] : memref<1x6xf32, #tpu.memory_space<vmem>>, vector<1x6xf32>
    %12 = vector.broadcast %11 : vector<1x6xf32> to vector<32x6xf32>
    %13 = arith.addf %10, %12 : vector<32x6xf32>
    %14 = math.tanh %13 : vector<32x6xf32>
    %c0_12 = arith.constant 0 : index
    %c0_13 = arith.constant 0 : index
    %15 = vector.load %arg7[%c0_12, %c0_13] : memref<32x6xf32, #tpu.memory_space<vmem>>, vector<32x6xf32>
    tpu.vector_store %arg7[%c0_12, %c0_13], %14 {strides = array<i32>} : memref<32x6xf32, #tpu.memory_space<vmem>>, vector<32x6xf32>,
    return
  }
  func.func @transform_0(%arg0: i32) -> (i32, i32) {
    %c0_i32 = arith.constant 0 : i32
    %c0_i32_0 = arith.constant 0 : i32
    return %arg0, %c0_i32 : i32, i32
  }
  func.func @transform_1(%arg0: i32) -> (i32, i32) {
    %c0_i32 = arith.constant 0 : i32
    %c0_i32_0 = arith.constant 0 : i32
    %c0_i32_1 = arith.constant 0 : i32
    return %c0_i32, %c0_i32_0 : i32, i32
  }
  func.func @transform_2(%arg0: i32) -> (i32, i32) {
    %c0_i32 = arith.constant 0 : i32
    %c0_i32_0 = arith.constant 0 : i32
    %c0_i32_1 = arith.constant 0 : i32
    return %c0_i32, %c0_i32_0 : i32, i32
  }
  func.func @transform_3(%arg0: i32) -> (i32, i32) {
    %c0_i32 = arith.constant 0 : i32
    %c0_i32_0 = arith.constant 0 : i32
    return %arg0, %c0_i32 : i32, i32
  }
  func.func @transform_4(%arg0: i32) -> (i32, i32) {
    %c0_i32 = arith.constant 0 : i32
    %c0_i32_0 = arith.constant 0 : i32
    %c0_i32_1 = arith.constant 0 : i32
    return %c0_i32, %c0_i32_0 : i32, i32
  }
  func.func @transform_5(%arg0: i32) -> (i32, i32) {
    %c0_i32 = arith.constant 0 : i32
    %c0_i32_0 = arith.constant 0 : i32
    %c0_i32_1 = arith.constant 0 : i32
    return %c0_i32, %c0_i32_0 : i32, i32
  }
  func.func @transform_6(%arg0: i32) -> (i32, i32) {
    %c0_i32 = arith.constant 0 : i32
    %c0_i32_0 = arith.constant 0 : i32
    return %arg0, %c0_i32 : i32, i32
  }
}

</mosaic_0001>

<bundles_post_ra>
// kernel: tile.8
= control target key start
LH: loop header
LB: loop body
LE: loop exit
PB: predicated region body
PF: predicated region fallthrough
CT: control target
= control target key end

     0   :  { %s40_s0 = inlined_call_operand.vmem [shape: f32[3], index: 0, kind: input, shape index: {}]   ;;  %s41_s1 = inlined_call_operand.vmem [shape: f32[25,3], index: 1, kind: output, shape index: {}]  }
   0x1   :  { %v4_v0 = vld [vmem:[%s40_s0] ss:$0 sm:$0xff] }
   0x2   :  { %5 = vst [vmem:[%s41_s1] sm:$0xff] %v4_v0  ;;  %12 = vst [vmem:[%s41_s1 + $0x8] sm:$0xff] %v4_v0 }
   0x3   :  { %13 = vst [vmem:[%s41_s1 + $0x10] sm:$0xff] %v4_v0  ;;  %14 = vst [vmem:[%s41_s1 + $0x18] sm:$0xff] %v4_v0 }

// kernel: tile.9
= control target key start
LH: loop header
LB: loop body
LE: loop exit
PB: predicated region body
PF: predicated region fallthrough
CT: control target
= control target key end

     0   :  { %s203_s10 = smov 72   ;;  %s204_s11 = smov 66   ;;  %vm3_vm0 = vcmask 23552   ;;  %vm9_vm1 = vcmask 613952   ;;  %vm15_vm2 = vcmask 589352   ;;  %vm21_vm3 = vcmask 564752   ;;  %s315_s0 = inlined_call_operand.vmem [shape: f32[25,3], index: 0, kind: input, shape index: {}]   ;;  %s316_s1 = inlined_call_operand.vmem [shape: f32[75], index: 1, kind: output, shape index: {}]  }
   0x1   :  { %v155_v0 = vld [vmem:[%s315_s0 + $0x18] sm:$0x1]   ;;  %v157_v1 = vld [vmem:[%s315_s0 + $0x16] sm:$0x1]   ;;  %v156_v2 = vld [vmem:[%s315_s0 + $0x17] sm:$0x1]  }
   0x2   :  { %7 = vrot.lane.b32.xlu0 %v155_v0, %s203_s10  ;;  %19 = vrot.lane.b32.xlu1 %v157_v1, %s204_s11  ;;  %v158_v3 = vld [vmem:[%s315_s0 + $0x15] sm:$0x1]   ;;  %s205_s16 = smov 69   ;;  %s206_s17 = smov 63   ;;  %v159_v4 = vld [vmem:[%s315_s0 + $0x14] sm:$0x1]  }
   0x3   :  { %v160_v5 = vld [vmem:[%s315_s0 + $0x13] sm:$0x1]   ;;  %s207_s22 = smov 60   ;;  %s208_s23 = smov 57   ;;  %v161_v6 = vld [vmem:[%s315_s0 + $0x12] sm:$0x1]  }
   0x4   :  { %v162_v7 = vld [vmem:[%s315_s0 + $0x11] sm:$0x1]   ;;  %v2_v8 = vld [vmem:[%s315_s0] sm:$0x1]   ;;  %s209_s30 = smov 54   ;;  %s210_s2 = smov 51  }
   0x5   :  { %4 = vst.msk [vmem:[#allocation0] sm:$0x1] %vm3_vm0, %v2_v8   ;;  %v163_v9 = vld [vmem:[%s315_s0 + $0x10] sm:$0x1]   ;;  %v164_v10 = vld [vmem:[%s315_s0 + $0xf] sm:$0x1]  }
   0x6   :  { %13 = vrot.lane.b32.xlu0 %v156_v2, %s205_s16  ;;  %25 = vrot.lane.b32.xlu1 %v158_v3, %s206_s17  ;;  %s211_s7 = smov 48   ;;  %s212_s8 = smov 45   ;;  %v165_v11 = vld [vmem:[%s315_s0 + $0xe] sm:$0x1]   ;;  %v166_v12 = vld [vmem:[%s315_s0 + $0xd] sm:$0x1]  }
   0x7   :  { %s213_s13 = smov 42   ;;  %s214_s14 = smov 39   ;;  %v167_v13 = vld [vmem:[%s315_s0 + $0xc] sm:$0x1]   ;;  %v168_v14 = vld [vmem:[%s315_s0 + $0xb] sm:$0x1]  }
   0x8   :  { %s215_s19 = smov 36   ;;  %s216_s20 = smov 33   ;;  %v169_v15 = vld [vmem:[%s315_s0 + $0xa] sm:$0x1]   ;;  %v170_v16 = vld [vmem:[%s315_s0 + $0x9] sm:$0x1]  }
   0x9   :  { %s217_s25 = smov 30   ;;  %s218_s26 = smov 27   ;;  %v171_v17 = vld [vmem:[%s315_s0 + $0x8] sm:$0x1]   ;;  %v172_v18 = vld [vmem:[%s315_s0 + $0x7] sm:$0x1]  }
   0xa   :  { %31 = vrot.lane.b32.xlu0 %v159_v4, %s207_s22  ;;  %37 = vrot.lane.b32.xlu1 %v160_v5, %s208_s23  ;;  %s220_s3 = smov 21   ;;  %v173_v19 = vld [vmem:[%s315_s0 + $0x6] sm:$0x1]   ;;  %v174_v20 = vld [vmem:[%s315_s0 + $0x5] sm:$0x1]   ;;  %s222_s9 = smov 15  }
   0xb   :  { %v175_v21 = vld [vmem:[%s315_s0 + $0x4] sm:$0x1]   ;;  %v176_v22 = vld [vmem:[%s315_s0 + $0x3] sm:$0x1]   ;;  %s224_s15 = smov 9   ;;  %vm27_vm4 = vcmask 540152  }
   0xc   :  { %v177_v23 = vld [vmem:[%s315_s0 + $0x2] sm:$0x1]   ;;  %v178_v24 = vld [vmem:[%s315_s0 + $0x1] sm:$0x1]   ;;  %s225_s0 = smov 6   ;;  %vm33_vm5 = vcmask 515552  }
   0xd   :  { %vm39_vm6 = vcmask 490952   ;;  %vm45_vm7 = vcmask 466352   ;;  %vm51_vm8 = vcmask 441752   ;;  %vm57_vm9 = vcmask 417152  }
   0xe   :  { %43 = vrot.lane.b32.xlu0 %v161_v6, %s209_s30  ;;  %49 = vrot.lane.b32.xlu1 %v162_v7, %s210_s2  ;;  %s219_s2 = smov 24   ;;  %vm63_vm10 = vcmask 392552   ;;  %vm69_vm11 = vcmask 367952   ;;  %vm75_vm12 = vcmask 343352   ;;  %vm81_vm13 = vcmask 318752  }
   0xf   :  { %vm87_vm14 = vcmask 294152   ;;  %vm93_vm15 = vcmask 269552   ;;  %vm99_vm0 = vcmask 244952  }
  0x12   :  { %55 = vrot.lane.b32.xlu0 %v163_v9, %s211_s7  ;;  %61 = vrot.lane.b32.xlu1 %v164_v10, %s212_s8  ;;  %s221_s8 = smov 18  }
  0x16   :  { %67 = vrot.lane.b32.xlu0 %v165_v11, %s213_s13  ;;  %73 = vrot.lane.b32.xlu1 %v166_v12, %s214_s14  ;;  %s223_s14 = smov 12  }
  0x1a   :  { %79 = vrot.lane.b32.xlu0 %v167_v13, %s215_s19  ;;  %85 = vrot.lane.b32.xlu1 %v168_v14, %s216_s20  ;;  %s226_s20 = smov 3  }
  0x1e   :  { %91 = vrot.lane.b32.xlu0 %v169_v15, %s217_s25  ;;  %97 = vrot.lane.b32.xlu1 %v170_v16, %s218_s26 }
  0x22   :  { %103 = vrot.lane.b32.xlu0 %v171_v17, %s219_s2  ;;  %109 = vrot.lane.b32.xlu1 %v172_v18, %s220_s3 }
  0x26   :  { %115 = vrot.lane.b32.xlu0 %v173_v19, %s221_s8  ;;  %121 = vrot.lane.b32.xlu1 %v174_v20, %s222_s9 }
  0x2a   :  { %127 = vrot.lane.b32.xlu0 %v175_v21, %s223_s14  ;;  %133 = vrot.lane.b32.xlu1 %v176_v22, %s224_s15 }
  0x2e   :  { %139 = vrot.lane.b32.xlu0 %v177_v23, %s225_s0  ;;  %145 = vrot.lane.b32.xlu1 %v178_v24, %s226_s20 }
  0x74   :  { %v8_v25 = vpop.permute.xlu0 %7   ;;  %v20_v26 = vpop.permute.xlu1 %19  }
  0x75   :  { %10 = vst.msk [vmem:[#allocation0] sm:$0x1] %vm9_vm1, %v8_v25   ;;  %vm105_vm1 = vcmask 220352  }
  0x78   :  { %v14_v27 = vpop.permute.xlu0 %13   ;;  %v26_v28 = vpop.permute.xlu1 %25  }
  0x79   :  { %16 = vst.msk [vmem:[#allocation0] sm:$0x1] %vm15_vm2, %v14_v27   ;;  %vm111_vm2 = vcmask 195752  }
  0x7a   :  { %22 = vst.msk [vmem:[#allocation0] sm:$0x1] %vm21_vm3, %v20_v26   ;;  %vm117_vm3 = vcmask 171152  }
  0x7b   :  { %28 = vst.msk [vmem:[#allocation0] sm:$0x1] %vm27_vm4, %v26_v28   ;;  %vm123_vm4 = vcmask 146552  }
  0x7c   :  { %v32_v29 = vpop.permute.xlu0 %31   ;;  %v38_v30 = vpop.permute.xlu1 %37  }
  0x7d   :  { %34 = vst.msk [vmem:[#allocation0] sm:$0x1] %vm33_vm5, %v32_v29   ;;  %vm129_vm5 = vcmask 121952  }
  0x7e   :  { %40 = vst.msk [vmem:[#allocation0] sm:$0x1] %vm39_vm6, %v38_v30   ;;  %vm135_vm6 = vcmask 97352  }
  0x80   :  { %v44_v31 = vpop.permute.xlu0 %43   ;;  %v50_v32 = vpop.permute.xlu1 %49  }
  0x81   :  { %46 = vst.msk [vmem:[#allocation0] sm:$0x1] %vm45_vm7, %v44_v31   ;;  %vm141_vm7 = vcmask 72752  }
  0x82   :  { %52 = vst.msk [vmem:[#allocation0] sm:$0x1] %vm51_vm8, %v50_v32   ;;  %vm147_vm8 = vcmask 48152  }
  0x84   :  { %v56_v33 = vpop.permute.xlu0 %55   ;;  %v62_v34 = vpop.permute.xlu1 %61  }
  0x85   :  { %58 = vst.msk [vmem:[#allocation0] sm:$0x1] %vm57_vm9, %v56_v33  }
  0x86   :  { %64 = vst.msk [vmem:[#allocation0] sm:$0x1] %vm63_vm10, %v62_v34  }
  0x88   :  { %v68_v35 = vpop.permute.xlu0 %67   ;;  %v74_v36 = vpop.permute.xlu1 %73  }
  0x89   :  { %70 = vst.msk [vmem:[#allocation0] sm:$0x1] %vm69_vm11, %v68_v35  }
  0x8a   :  { %76 = vst.msk [vmem:[#allocation0] sm:$0x1] %vm75_vm12, %v74_v36  }
  0x8c   :  { %v80_v37 = vpop.permute.xlu0 %79   ;;  %v86_v38 = vpop.permute.xlu1 %85  }
  0x8d   :  { %82 = vst.msk [vmem:[#allocation0] sm:$0x1] %vm81_vm13, %v80_v37  }
  0x8e   :  { %88 = vst.msk [vmem:[#allocation0] sm:$0x1] %vm87_vm14, %v86_v38  }
  0x90   :  { %v92_v39 = vpop.permute.xlu0 %91   ;;  %v98_v40 = vpop.permute.xlu1 %97  }
  0x91   :  { %94 = vst.msk [vmem:[#allocation0] sm:$0x1] %vm93_vm15, %v92_v39  }
  0x92   :  { %100 = vst.msk [vmem:[#allocation0] sm:$0x1] %vm99_vm0, %v98_v40  }
  0x94   :  { %v104_v41 = vpop.permute.xlu0 %103   ;;  %v110_v42 = vpop.permute.xlu1 %109  }
  0x95   :  { %106 = vst.msk [vmem:[#allocation0] sm:$0x1] %vm105_vm1, %v104_v41  }
  0x96   :  { %112 = vst.msk [vmem:[#allocation0] sm:$0x1] %vm111_vm2, %v110_v42  }
  0x98   :  { %v116_v43 = vpop.permute.xlu0 %115   ;;  %v122_v44 = vpop.permute.xlu1 %121  }
  0x99   :  { %118 = vst.msk [vmem:[#allocation0] sm:$0x1] %vm117_vm3, %v116_v43  }
  0x9a   :  { %124 = vst.msk [vmem:[#allocation0] sm:$0x1] %vm123_vm4, %v122_v44  }
  0x9c   :  { %v128_v45 = vpop.permute.xlu0 %127   ;;  %v134_v46 = vpop.permute.xlu1 %133  }
  0x9d   :  { %130 = vst.msk [vmem:[#allocation0] sm:$0x1] %vm129_vm5, %v128_v45  }
  0x9e   :  { %136 = vst.msk [vmem:[#allocation0] sm:$0x1] %vm135_vm6, %v134_v46  }
  0xa0   :  { %v140_v47 = vpop.permute.xlu0 %139   ;;  %v146_v48 = vpop.permute.xlu1 %145  }
  0xa1   :  { %142 = vst.msk [vmem:[#allocation0] sm:$0x1] %vm141_vm7, %v140_v47  }
  0xa2   :  { %148 = vst.msk [vmem:[#allocation0] sm:$0x1] %vm147_vm8, %v146_v48  }
  0xa9   :  { %v152_v49 = vld [vmem:[#allocation0] sm:$0x1] }
  0xaa   :  { %154 = vst [vmem:[%s316_s1] sm:$0x1] %v152_v49 }

// kernel: encoder_forward.1
= control target key start
LH: loop header
LB: loop body
LE: loop exit
PB: predicated region body
PF: predicated region fallthrough
CT: control target
= control target key end

     0   :  { %s1299_s0 = inlined_call_operand.vmem [shape: bf16[32,640], index: 0, kind: input, shape index: {}]   ;;  %s1300_s1 = inlined_call_operand.vmem [shape: bf16[640,128], index: 1, kind: input, shape index: {}]   ;;  %s1301_s2 = inlined_call_operand.vmem [shape: f32[1,128], index: 2, kind: input, shape index: {}]   ;;  %s1302_s3 = inlined_call_operand.vmem [shape: f32[32,128], index: 3, kind: input, shape index: {}]   ;;  %s1303_s4 = inlined_call_operand.vmem [shape: f32[128,6], index: 4, kind: input, shape index: {}]   ;;  %s1304_s5 = inlined_call_operand.vmem [shape: f32[1,6], index: 5, kind: input, shape index: {}]   ;;  %s1305_s6 = inlined_call_operand.hbm [shape: f32[32,6], index: 6, kind: output, shape index: {}]  }
   0x1   :  { %v939_v0 = vld [vmem:[%s1300_s1 + $0x40] sm:$0xff]   ;;  %v943_v4 = vld [vmem:[%s1300_s1 + $0x48] sm:$0xff]   ;;  %v947_v8 = vld [vmem:[%s1300_s1 + $0x50] sm:$0xff]  }
   0x2   :  { %v940_v1 = vld [vmem:[%s1300_s1] sm:$0xff]   ;;  %760 = vmatprep.subr.bf16.mxu0 %v939_v0  ;;  %v944_v5 = vld [vmem:[%s1300_s1 + $0x8] sm:$0xff]   ;;  %v948_v9 = vld [vmem:[%s1300_s1 + $0x10] sm:$0xff]  }
   0x3   :  { %v941_v2 = vld [vmem:[%s1300_s1 + $0xc0] sm:$0xff]   ;;  %761 = vmatpush3.bf16.msra.mxu0 %v940_v1  ;;  %v945_v6 = vld [vmem:[%s1300_s1 + $0xc8] sm:$0xff]   ;;  %v949_v10 = vld [vmem:[%s1300_s1 + $0xd0] sm:$0xff]  }
   0x4   :  { %v942_v3 = vld [vmem:[%s1300_s1 + $0x80] sm:$0xff]   ;;  %788 = vmatprep.subr.bf16.mxu1 %v941_v2  ;;  %762 = vmatprep.subr.bf16.mxu0 %v943_v4  ;;  %v946_v7 = vld [vmem:[%s1300_s1 + $0x88] sm:$0xff]   ;;  %v950_v11 = vld [vmem:[%s1300_s1 + $0x90] sm:$0xff]  }
   0x5   :  { %789 = vmatpush3.bf16.msra.mxu1 %v942_v3  ;;  %v951_v12 = vld [vmem:[%s1300_s1 + $0x58] sm:$0xff]   ;;  %v955_v16 = vld [vmem:[%s1300_s1 + $0x60] sm:$0xff]   ;;  %v959_v20 = vld [vmem:[%s1300_s1 + $0x68] sm:$0xff]  }
   0x6   :  { %790 = vmatprep.subr.bf16.mxu1 %v945_v6  ;;  %v952_v13 = vld [vmem:[%s1300_s1 + $0x18] sm:$0xff]   ;;  %v956_v17 = vld [vmem:[%s1300_s1 + $0x20] sm:$0xff]   ;;  %v960_v21 = vld [vmem:[%s1300_s1 + $0x28] sm:$0xff]  }
   0x7   :  { %763 = vmatpush3.bf16.msra.mxu0 %v944_v5  ;;  %v953_v14 = vld [vmem:[%s1300_s1 + $0xd8] sm:$0xff]   ;;  %v957_v18 = vld [vmem:[%s1300_s1 + $0xe0] sm:$0xff]   ;;  %v961_v22 = vld [vmem:[%s1300_s1 + $0xe8] sm:$0xff]  }
   0x8   :  { %764 = vmatprep.subr.bf16.mxu0 %v947_v8  ;;  %v954_v15 = vld [vmem:[%s1300_s1 + $0x98] sm:$0xff]   ;;  %v958_v19 = vld [vmem:[%s1300_s1 + $0xa0] sm:$0xff]   ;;  %v962_v23 = vld [vmem:[%s1300_s1 + $0xa8] sm:$0xff]  }
   0x9   :  { %791 = vmatpush3.bf16.msra.mxu1 %v946_v7  ;;  %v963_v24 = vld [vmem:[%s1300_s1 + $0x70] sm:$0xff]   ;;  %v967_v28 = vld [vmem:[%s1300_s1 + $0x78] sm:$0xff]   ;;  %v974_v34 = vld [vmem:[%s1300_s1 + $0x100] sm:$0xff]  }
   0xa   :  { %792 = vmatprep.subr.bf16.mxu1 %v949_v10  ;;  %v964_v25 = vld [vmem:[%s1300_s1 + $0x30] sm:$0xff]   ;;  %v968_v29 = vld [vmem:[%s1300_s1 + $0x38] sm:$0xff]   ;;  %v977_v36 = vld [vmem:[%s1299_s0 + $0xc] ss:$20 sps:$4 sm:$0xff]  }
   0xb   :  { %765 = vmatpush3.bf16.msra.mxu0 %v948_v9  ;;  %v965_v26 = vld [vmem:[%s1300_s1 + $0xf0] sm:$0xff]   ;;  %v969_v30 = vld [vmem:[%s1300_s1 + $0xf8] sm:$0xff]   ;;  %v978_v37 = vld [vmem:[%s1300_s1 + $0x108] sm:$0xff]   ;;  %497 = vmatprep.mubr.bf16.mxu1 %v977_v36 }
   0xc   :  { %766 = vmatprep.subr.bf16.mxu0 %v951_v12  ;;  %v966_v27 = vld [vmem:[%s1300_s1 + $0xb0] sm:$0xff]   ;;  %v972_v32 = vld [vmem:[%s1299_s0 + $0x4] ss:$20 sps:$4 sm:$0xff]   ;;  %v975_v35 = vld [vmem:[%s1299_s0 + $0x8] ss:$20 sps:$4 sm:$0xff]  }
   0xd   :  { %793 = vmatpush3.bf16.msra.mxu1 %v950_v11  ;;  %v970_v31 = vld [vmem:[%s1299_s0] ss:$20 sps:$4 sm:$0xff]   ;;  %v973_v33 = vld [vmem:[%s1300_s1 + $0xb8] sm:$0xff]   ;;  %448 = vmatprep.mubr.bf16.mxu0 %v972_v32  ;;  %v988_v43 = vld [vmem:[%s1299_s0 + $0x30] ss:$20 sps:$4 sm:$0xff]  }
   0xe   :  { %794 = vmatprep.subr.bf16.mxu1 %v953_v14  ;;  %v979_v38 = vld [vmem:[%s1300_s1 + $0x110] sm:$0xff]   ;;  %v982_v39 = vld [vmem:[%s1299_s0 + $0x2c] ss:$20 sps:$4 sm:$0xff]   ;;  %v980_v40 = vld [vmem:[%s1300_s1 + $0x118] sm:$0xff]  }
   0xf   :  { %767 = vmatpush3.bf16.msra.mxu0 %v952_v13  ;;  %v985_v41 = vld [vmem:[%s1299_s0 + $0x28] ss:$20 sps:$4 sm:$0xff]   ;;  %v981_v44 = vld [vmem:[%s1300_s1 + $0x120] sm:$0xff]  }
  0x10   :  { %768 = vmatprep.subr.bf16.mxu0 %v955_v16  ;;  %v986_v42 = vld [vmem:[%s1299_s0 + $0x34] ss:$20 sps:$4 sm:$0xff]   ;;  %v991_v45 = vld [vmem:[%s1299_s0 + $0x10] ss:$20 sps:$4 sm:$0xff]  }
  0x11   :  { %795 = vmatpush3.bf16.msra.mxu1 %v954_v15 }
  0x12   :  { %796 = vmatprep.subr.bf16.mxu1 %v957_v18 }
  0x13   :  { %769 = vmatpush3.bf16.msra.mxu0 %v956_v17 }
  0x14   :  { %770 = vmatprep.subr.bf16.mxu0 %v959_v20 }
  0x15   :  { %797 = vmatpush3.bf16.msra.mxu1 %v958_v19 }
  0x16   :  { %798 = vmatprep.subr.bf16.mxu1 %v961_v22 }
  0x17   :  { %771 = vmatpush3.bf16.msra.mxu0 %v960_v21 }
  0x18   :  { %772 = vmatprep.subr.bf16.mxu0 %v963_v24 }
  0x19   :  { %799 = vmatpush3.bf16.msra.mxu1 %v962_v23 }
  0x1a   :  { %800 = vmatprep.subr.bf16.mxu1 %v965_v26 }
  0x1b   :  { %773 = vmatpush3.bf16.msra.mxu0 %v964_v25 }
  0x1c   :  { %774 = vmatprep.subr.bf16.mxu0 %v967_v28 }
  0x1d   :  { %801 = vmatpush3.bf16.msra.mxu1 %v966_v27 }
  0x1e   :  { %802 = vmatprep.subr.bf16.mxu1 %v969_v30 }
  0x1f   :  { %775 = vmatpush3.bf16.msra.mxu0 %v968_v29 }
  0x20   :  { %846 = vmatprep.subr.bf16.mxu0 %v974_v34 }
  0x21   :  { %803 = vmatpush3.bf16.msra.mxu1 %v973_v33 }
  0x22   :  { %449 = vmatmul.mubr.bf16.vlgmr.msra.gmra.mrb[0].mxu0 %v970_v31 }
  0x23   :  { %847 = vmatpush3.bf16.msra.mxu0 %v974_v34  ;;  %456 = vmatprep.mubr.bf16.mxu0 %v982_v39 }
  0x24   :  { %498 = vmatmul.mubr.bf16.vlgmr.msra.gmra.mrb[0].mxu1 %v975_v35  ;;  %848 = vmatprep.subr.bf16.mxu0 %v978_v37 }
  0x25   :  { %505 = vmatprep.mubr.bf16.mxu1 %v986_v42 }
  0x27   :  { %849 = vmatpush3.bf16.msra.mxu0 %v978_v37 }
  0x28   :  { %850 = vmatprep.subr.bf16.mxu0 %v979_v38 }
  0x2a   :  { %457 = vmatmul.mubr.bf16.gmra.mrb[4].mxu0 %v985_v41 }
  0x2b   :  { %851 = vmatpush3.bf16.msra.mxu0 %v979_v38 }
  0x2c   :  { %852 = vmatprep.subr.bf16.mxu0 %v980_v40  ;;  %506 = vmatmul.mubr.bf16.gmra.mrb[4].mxu1 %v988_v43 }
  0x2d   :  { %11 = vsyncpa [#allocation3], 0  ;;  %862 = vmatprep.mubr.bf16.mxu0 %v991_v45  ;;  %v984_v46 = vld [vmem:[%s1300_s1 + $0x128] sm:$0xff]   ;;  %v989_v47 = vld [vmem:[%s1300_s1 + $0x130] sm:$0xff]   ;;  %vm687_vm0 = vcmask 48128  }
  0x2e   :  { %v990_v48 = vld [vmem:[%s1300_s1 + $0x138] sm:$0xff]   ;;  %v575_v50 = vld [vmem:[%s1303_s4] sm:$0xff]  ;;  %v576_v51 = vld [vmem:[%s1303_s4 + $0x8] sm:$0xff] }
  0x2f   :  { %853 = vmatpush3.bf16.msra.mxu0 %v980_v40  ;;  %v992_v49 = vld [vmem:[%s1299_s0 + $0x38] ss:$20 sps:$4 sm:$0xff]   ;;  %v904_v52 = vpack.c.bf16 %v576_v51, %v575_v50  ;;  %v577_v53 = vld [vmem:[%s1303_s4 + $0x10] sm:$0xff]  ;;  %v579_v56 = vld [vmem:[%s1303_s4 + $0x20] sm:$0xff] }
  0x30   :  { %854 = vmatprep.subr.bf16.mxu0 %v981_v44  ;;  %v578_v54 = vld [vmem:[%s1303_s4 + $0x18] sm:$0xff]  ;;  %v580_v57 = vld [vmem:[%s1303_s4 + $0x28] sm:$0xff]  ;;  %v581_v58 = vld [vmem:[%s1303_s4 + $0x30] sm:$0xff] }
  0x31   :  { %905 = vmatprep.subr.bf16.mxu1 %v904_v52  ;;  %v908_v55 = vpack.c.bf16 %v578_v54, %v577_v53  ;;  %v912_v59 = vpack.c.bf16 %v580_v57, %v579_v56  ;;  %v582_v60 = vld [vmem:[%s1303_s4 + $0x38] sm:$0xff]  ;;  %v583_v62 = vld [vmem:[%s1303_s4 + $0x40] sm:$0xff]  ;;  %v584_v63 = vld [vmem:[%s1303_s4 + $0x48] sm:$0xff] }
  0x32   :  { %907 = vmatpush3.bf16.msra.mxu1 %v904_v52  ;;  %v916_v61 = vpack.c.bf16 %v582_v60, %v581_v58  ;;  %v920_v0 = vpack.c.bf16 %v584_v63, %v583_v62  ;;  %v585_v1 = vld [vmem:[%s1303_s4 + $0x50] sm:$0xff]  ;;  %v586_v2 = vld [vmem:[%s1303_s4 + $0x58] sm:$0xff]  ;;  %v587_v4 = vld [vmem:[%s1303_s4 + $0x60] sm:$0xff] }
  0x33   :  { %855 = vmatpush3.bf16.msra.mxu0 %v981_v44  ;;  %909 = vmatprep.subr.bf16.mxu1 %v908_v55  ;;  %v924_v3 = vpack.c.bf16 %v586_v2, %v585_v1  ;;  %v588_v5 = vld [vmem:[%s1303_s4 + $0x68] sm:$0xff]  ;;  %v589_v6 = vld [vmem:[%s1303_s4 + $0x70] sm:$0xff]  ;;  %v590_v8 = vld [vmem:[%s1303_s4 + $0x78] sm:$0xff] }
  0x34   :  { %856 = vmatprep.subr.bf16.mxu0 %v984_v46  ;;  %v928_v7 = vpack.c.bf16 %v588_v5, %v587_v4  ;;  %v932_v9 = vpack.c.bf16 %v590_v8, %v589_v6  ;;  %v708_v11 = vld [vmem:[%s1301_s2] ss:$0 sm:$0xff]  ;;  %v568_v53 = vld [vmem:[%s1302_s3 + $0x8] sm:$0xff]  ;;  %v569_v56 = vld [vmem:[%s1302_s3 + $0x10] sm:$0xff] }
  0x35   :  { %v567_v51 = vld [vmem:[%s1302_s3] sm:$0xff] }
  0x36   :  { %911 = vmatpush3.bf16.msra.mxu1 %v908_v55  ;;  %v759_v63 = vld [vmem:[%s1304_s5] ss:$0 sm:$0xff] }
  0x37   :  { %857 = vmatpush3.bf16.msra.mxu0 %v984_v46  ;;  %913 = vmatprep.subr.bf16.mxu1 %v912_v59 }
  0x38   :  { %858 = vmatprep.subr.bf16.mxu0 %v989_v47 }
  0x3a   :  { %915 = vmatpush3.bf16.msra.mxu1 %v912_v59 }
  0x3b   :  { %859 = vmatpush3.bf16.msra.mxu0 %v989_v47  ;;  %917 = vmatprep.subr.bf16.mxu1 %v916_v61 }
  0x3c   :  { %860 = vmatprep.subr.bf16.mxu0 %v990_v48 }
  0x3e   :  { %919 = vmatpush3.bf16.msra.mxu1 %v916_v61  ;;  %v570_v61 = vld [vmem:[%s1302_s3 + $0x18] sm:$0xff]  ;;  %s1033_s3 = smov [#allocation2]  }
  0x3f   :  { %861 = vmatpush3.bf16.msra.mxu0 %v990_v48  ;;  %921 = vmatprep.subr.bf16.mxu1 %v920_v0  ;;  %s697_s15 = sshll.u32 %s1033_s3, 4  ;;  %s698_s15 = int_to_ptr.vmem [resolvable:$true] %s697_s15 }
  0x40   :  { %s1009_s5 = scalar_lea.vmem %s698_s15, 512  ;;  %p1014_p1 = scmp.lt.s32.totalorder %s698_s15, %s698_s15 }
  0x41   :  { %p1010_p0 = scmp.ne.s32.totalorder %s698_s15, %s1009_s5  ;;  %p1015_p2 = scmp.lt.s32.totalorder %s1009_s5, %s1009_s5 }
  0x42   :  { %863 = vmatmul.mubr.bf16.vlgmr.msra.gmra.mrb[8].mxu0 %v992_v49  ;;  %923 = vmatpush3.bf16.msra.mxu1 %v920_v0 }
  0x43   :  { %925 = vmatprep.subr.bf16.mxu1 %v924_v3  ;;  %p1016_p3 = por %p1015_p2, %p1014_p1 }
  0x45   :  { %p1017_p4 = pnand %p1016_p3, %p1010_p0 }
  0x46   :  { %927 = vmatpush3.bf16.msra.mxu1 %v924_v3 }
  0x47   :  { %929 = vmatprep.subr.bf16.mxu1 %v928_v7 }
  0x4a   :  { %931 = vmatpush3.bf16.msra.mxu1 %v928_v7 }
  0x4b   :  { %933 = vmatprep.subr.bf16.mxu1 %v932_v9 }
  0x4e   :  { %935 = vmatpush3.bf16.msra.mxu1 %v932_v9 }
  0xf5   :  { %v776_v10 = vpop.f32.mrb[0].mxu0 }
  0xf6   :  { %v777_v12 = vpop.f32.mrb[1].mxu0 }
  0xf7   :  { %v778_v13 = vadd.f32 %v777_v12, %v776_v10  ;;  %v779_v14 = vpop.f32.mrb[2].mxu0  ;;  %v804_v15 = vpop.f32.mrb[0].mxu1 }
  0xf8   :  { %v780_v16 = vpop.f32.mrb[3].mxu0  ;;  %v805_v19 = vpop.f32.mrb[1].mxu1 }
  0xf9   :  { %v451_v17 = vadd.f32 %v778_v13, %v708_v11  ;;  %v781_v18 = vadd.f32 %v780_v16, %v779_v14  ;;  %v806_v20 = vadd.f32 %v805_v19, %v804_v15  ;;  %v807_v21 = vpop.f32.mrb[2].mxu1 }
  0xfa   :  { %v808_v23 = vpop.f32.mrb[3].mxu1 }
  0xfb   :  { %v454_v22 = vadd.f32 %v781_v18, %v708_v11  ;;  %v809_v24 = vadd.f32 %v808_v23, %v807_v21  ;;  %v500_v25 = vadd.f32 %v806_v20, %v451_v17 }
  0xfd   :  { %v782_v26 = vpop.f32.mrb[4].mxu0  ;;  %v503_v28 = vadd.f32 %v809_v24, %v454_v22 }
  0xfe   :  { %v783_v27 = vpop.f32.mrb[5].mxu0 }
  0xff   :  { %v784_v29 = vadd.f32 %v783_v27, %v782_v26  ;;  %v785_v30 = vpop.f32.mrb[6].mxu0  ;;  %v810_v31 = vpop.f32.mrb[4].mxu1 }
 0x100   :  { %v786_v32 = vpop.f32.mrb[7].mxu0  ;;  %v811_v35 = vpop.f32.mrb[5].mxu1 }
 0x101   :  { %v459_v33 = vadd.f32 %v784_v29, %v708_v11  ;;  %v787_v34 = vadd.f32 %v786_v32, %v785_v30  ;;  %v812_v36 = vadd.f32 %v811_v35, %v810_v31  ;;  %v813_v37 = vpop.f32.mrb[6].mxu1 }
 0x102   :  { %v814_v39 = vpop.f32.mrb[7].mxu1 }
 0x103   :  { %v462_v38 = vadd.f32 %v787_v34, %v708_v11  ;;  %v815_v40 = vadd.f32 %v814_v39, %v813_v37  ;;  %v508_v41 = vadd.f32 %v812_v36, %v459_v33 }
 0x105   :  { %v511_v42 = vadd.f32 %v815_v40, %v462_v38 }
 0x115   :  { %v864_v43 = vpop.f32.mrb[8].mxu0 }
 0x116   :  { %v557_v44 = vadd.f32 %v864_v43, %v508_v41  ;;  %v548_v45 = vpop.f32.mrb[9].mxu0 }
 0x117   :  { %v549_v46 = vadd.f32 %v548_v45, %v500_v25  ;;  %v865_v47 = vpop.f32.mrb[10].mxu0 }
 0x118   :  { %v560_v48 = vadd.f32 %v865_v47, %v511_v42  ;;  %v551_v49 = vpop.f32.mrb[11].mxu0 }
 0x119   :  { %993 = vtanh.f32 %v549_v46  ;;  %v552_v50 = vadd.f32 %v551_v49, %v503_v28 }
 0x11a   :  { %995 = vtanh.f32 %v557_v44 }
 0x11b   :  { %997 = vtanh.f32 %v552_v50 }
 0x11c   :  { %999 = vtanh.f32 %v560_v48 }
 0x123   :  { %v994_v52 = vpop.eup %993 }
 0x124   :  { %v996_v54 = vpop.eup %995  ;;  %v571_v55 = vmul.f32 %v994_v52, %v567_v51 }
 0x125   :  { %v998_v57 = vpop.eup %997  ;;  %v573_v60 = vmul.f32 %v996_v54, %v569_v56 }
 0x126   :  { %898 = vmatprep.mubr.f32.mxu1 %v571_v55  ;;  %v572_v58 = vmul.f32 %v998_v57, %v568_v53  ;;  %v1000_v59 = vpop.eup %999 }
 0x127   :  { %v574_v62 = vmul.f32 %v1000_v59, %v570_v61 }
 0x128   :  { %899 = vmatmul.mubr.f32.vlgmr.msra.gmra.mrb[8].mxu1 %v572_v58 }
 0x129   :  { %901 = vmatprep.mubr.f32.mxu1 %v573_v60 }
 0x12c   :  { %902 = vmatmul.mubr.f32.gmra.mrb[10].mxu1 %v574_v62 }
 0x1fb   :  { %v900_v0 = vpop.f32.mrb[8].mxu1 }
 0x1fc   :  { %v670_v1 = vadd.f32 %v900_v0, %v759_v63  ;;  %v664_v2 = vpop.f32.mrb[9].mxu1 }
 0x1fd   :  { %v665_v3 = vadd.f32 %v759_v63, %v664_v2 }
 0x1fe   :  { %1001 = vtanh.f32 %v670_v1 }
 0x1ff   :  { %1003 = vtanh.f32 %v665_v3  ;;  %v903_v4 = vpop.f32.mrb[10].mxu1 }
 0x200   :  { %v680_v5 = vadd.f32 %v903_v4, %v759_v63  ;;  %v674_v6 = vpop.f32.mrb[11].mxu1 }
 0x201   :  { %v675_v7 = vadd.f32 %v759_v63, %v674_v6 }
 0x202   :  { %1005 = vtanh.f32 %v680_v5 }
 0x203   :  { %1007 = vtanh.f32 %v675_v7 }
 0x208   :  { %v1002_v8 = vpop.eup %1001 }
 0x209   :  { %v1004_v9 = vpop.eup %1003  ;;  %689 = vst.msk [vmem:[#allocation2 + $0x8] sm:$0xff] %vm687_vm0, %v1002_v8 }
 0x20a   :  { %688 = vst.msk [vmem:[#allocation2] sm:$0xff] %vm687_vm0, %v1004_v9 }
 0x20c   :  { %v1006_v10 = vpop.eup %1005 }
 0x20d   :  { %v1008_v11 = vpop.eup %1007  ;;  %691 = vst.msk [vmem:[#allocation2 + $0x18] sm:$0xff] %vm687_vm0, %v1006_v10 }
 0x20e   :  { %690 = vst.msk [vmem:[#allocation2 + $0x10] sm:$0xff] %vm687_vm0, %v1008_v11 }
 0x20f   :  { %1020 = shalt.err (!%p1017_p4)
}
 0x210   :  { %s1021_s18 = scalar_lea.hbm %s1305_s6, 512 }
 0x211   :  { %p1022_p5 = scmp.ne.s32.totalorder %s1305_s6, %s1021_s18  ;;  %p1025_p6 = scmp.lt.u32.totalorder %s1021_s18, %s1305_s6 }
 0x213   :  { %p1027_p7 = pnand %p1025_p6, %p1022_p5 }
 0x215   :  { %1030 = shalt.err (!%p1027_p7)
}
 0x216   :  { %s1034_s23 = smov 128   ;;  %s1035_s24 = smov 8  }
 0x217   :  { %703 = dma.vmem_to_hbm [thread:$0]  %s698_s15, 512, %s1305_s6, [#allocation3], %s1034_s23, %s1034_s23, %s1035_s24  }
 0x218   :  { %1031 = dma.done.wait [#allocation3], 512  }
 0x219   :  { %1032 = vsyncadd [#allocation3], 4294966784 }
 0x21a   :  { %707 = vsyncpa [#allocation3], 1 }

</bundles_post_ra>
